<compile_context>
chip_gen: v5e
topology: v5e:2x2
jax: 0.10.0
libtpu: 0.0.40
codegen_flags: <defaults>
</compile_context>

<pallas_src>
import jax
import jax.numpy as jnp
from jax.experimental import pallas as pl
from jax.experimental.pallas import tpu as pltpu

NEG_SLOPE = 0.2  # nn.LeakyReLU(negative_slope=0.2)


# -----------------------------------------------------------------------------
# Fused kernel factory: all per-layer sizes are static (closed over).
# -----------------------------------------------------------------------------
def _make_fused_kernel(H, pad, kf, scales, layer_t, chunks):
    """Kernel arg order: x, pad_mat, wt_0..wt_{L-1}, r_0..r_{L-1}, bias(SMEM),
    out, buf_1..buf_{L-1} (VMEM scratch intermediates)."""
    L = len(scales)

    def kernel(*refs):
        x_ref = refs[0]                       # (1, H, tt)            VMEM
        pm_ref = refs[1]                      # (Hp, H) 0/1 pad mat   VMEM
        wt_refs = refs[2:2 + L]               # (Kf, c_l*s_l) tiled w VMEM
        r_refs = refs[2 + L:2 + 2 * L]        # (c_l, c_l*s_l) 0/1 R  VMEM
        b_ref = refs[2 + 2 * L]               # (L,) biases           SMEM
        o_ref = refs[3 + 2 * L]               # (1, H, tt*S)          VMEM
        bufs = refs[4 + 2 * L:]               # L-1 intermediates (H, layer_t[l])

        pm = pm_ref[...]                      # (Hp, H), identity rows at offset `pad`

        for l in range(L):
            s = scales[l]
            t_in = layer_t[l]
            c = chunks[l]
            n_ch = t_in // c
            last = (l == L - 1)

            bias = b_ref[l]                                    # scalar (SMEM), hoisted
            r_mat = r_refs[l][...]                             # (c, c*s), hoisted
            w_rows = [wt_refs[l][k] for k in range(kf)]        # each (c*s,), hoisted

            for ci in range(n_ch):
                lo_in = ci * c
                if l == 0:
                    chunk = x_ref[0, :, lo_in:lo_in + c]       # (H, c)
                else:
                    chunk = bufs[l - 1][:, lo_in:lo_in + c]    # (H, c)

                # Freq zero-padding via a tiny 0/1 matmul: (Hp, H) @ (H, c).
                xp_c = jnp.dot(pm, chunk, preferred_element_type=jnp.float32)

                # Time upsampling: replicate every column s times already in
                # the interleaved t*s+kw lane order (single small MXU matmul).
                xrep = jnp.dot(xp_c, r_mat,
                               preferred_element_type=jnp.float32)  # (Hp, c*s)

                # Freq taps on the VPU: Kf FMAs per output element.
                acc = jnp.zeros((H, c * s), jnp.float32)
                for k in range(kf):
                    shift = kf - 1 - k                         # exact for odd Kf
                    acc = acc + xrep[shift:shift + H, :] * w_rows[k]
                acc = acc + bias
                y = jnp.where(acc >= 0.0, acc, NEG_SLOPE * acc)  # LeakyReLU(0.2)

                lo_out = ci * c * s
                if last:
                    o_ref[0, :, lo_out:lo_out + c * s] = y     # lane-dense store
                else:
                    bufs[l][:, lo_out:lo_out + c * s] = y      # stays in VMEM

    return kernel


# -----------------------------------------------------------------------------
# Tiling helpers
# -----------------------------------------------------------------------------
def _prod(xs):
    p = 1
    for v in xs:
        p *= int(v)
    return p


def _chunk_size(t):
    """Largest divisor of t that is <= 128 (bounds the expansion matrix size)."""
    if t <= 128:
        return t
    if t % 128 == 0:
        return 128
    for c in range(128, 0, -1):
        if t % c == 0:
            return c
    return t


def _choose_time_tile(T, H, scales, budget_bytes=20 * 1024 * 1024):
    """Largest legal input-time tile whose VMEM footprint fits the budget.

    A tile tt is legal if tt divides T and (tt % 128 == 0 or tt == T), so every
    pallas block keeps a 128-multiple (or full-extent) lane dimension.
    """
    S = _prod(scales)

    def cost(tt):
        inter = 0
        t = tt
        for s in scales[:-1]:
            t *= int(s)
            inter += t
        # double-buffered in/out blocks + resident intermediates + slack
        return 4 * (2 * H * tt + 2 * H * tt * S + H * inter) + (1 << 20)

    best = None
    for d in range(1, T + 1):
        if T % d != 0:
            continue
        if d != T and d % 128 != 0:
            continue
        if cost(d) <= budget_bytes and (best is None or d > best):
            best = d
    if best is None:  # nothing fits the budget: take the smallest legal tile
        for d in range(1, T + 1):
            if T % d == 0 and (d % 128 == 0 or d == T):
                best = d
                break
    return best


# -----------------------------------------------------------------------------
# Parameter setup (weight-norm g * v / ||v|| folded here; pure setup, not forward)
# -----------------------------------------------------------------------------
def init_params(key, upsample_scales, freq_axis_kernel_size):
    params = []
    kf = freq_axis_kernel_size
    for s in upsample_scales:
        key, k1, k2, k3 = jax.random.split(key, 4)
        v = (1.0 / kf) + 0.1 * jax.random.normal(k1, (kf, s), jnp.float32)
        g = jax.random.uniform(k2, (), jnp.float32, minval=0.5, maxval=1.5)
        b = 0.01 * jax.random.normal(k3, (), jnp.float32)
        w_eff = g * v / jnp.linalg.norm(v)                 # effective conv weight
        params.append((w_eff, b))
    return params


# -----------------------------------------------------------------------------
# Forward wrapper: one fused pallas_call for the whole layer chain
# -----------------------------------------------------------------------------
def upsample_conv_forward(c, params, upsample_scales):
    """c: (B, 1, F, T) float32 -> (B, 1, F, T * prod(upsample_scales))."""
    scales = tuple(int(s) for s in upsample_scales)
    L = len(scales)
    x = c[:, 0].astype(jnp.float32)                         # (B, H, T), time last
    B, H, T = x.shape
    kf = int(params[0][0].shape[0])
    # TODO(synk): even freq_axis_kernel_size changes the ConvTranspose2d output
    # freq extent; only the odd case (wavenet default 3) is implemented.
    assert kf % 2 == 1, "freq_axis_kernel_size must be odd"
    pad = (kf - 1) // 2
    Hp = H + 2 * pad
    S = _prod(scales)

    tt = _choose_time_tile(T, H, scales)
    n_t = T // tt

    layer_t = []                                            # per-layer input time width
    t = tt
    for s in scales:
        layer_t.append(t)
        t *= s
    chunks = [_chunk_size(tl) for tl in layer_t]

    # Small per-layer constants (no (tt, tt*s)-sized U matrices streamed from HBM).
    pad_mat = (jnp.arange(Hp)[:, None] ==
               (jnp.arange(H)[None, :] + pad)).astype(jnp.float32)        # (Hp, H)
    wt_inputs, r_inputs = [], []
    for l, (w_eff, _) in enumerate(params):
        s, cl = scales[l], chunks[l]
        wt_inputs.append(jnp.tile(w_eff.astype(jnp.float32), (1, cl)))    # (Kf, cl*s)
        rows = jnp.arange(cl, dtype=jnp.int32)[:, None]
        cols = jnp.arange(cl * s, dtype=jnp.int32)[None, :]
        r_inputs.append((cols // s == rows).astype(jnp.float32))          # (cl, cl*s)
    bias_all = jnp.stack([b for (_, b) in params]).astype(jnp.float32)    # (L,)

    kernel = _make_fused_kernel(H, pad, kf, scales, layer_t, chunks)

    in_specs = [pl.BlockSpec((1, H, tt), lambda b, ti: (b, 0, ti)),
                pl.BlockSpec(pad_mat.shape, lambda b, ti: (0, 0))]
    in_specs += [pl.BlockSpec(w.shape, lambda b, ti: (0, 0)) for w in wt_inputs]
    in_specs += [pl.BlockSpec(r.shape, lambda b, ti: (0, 0)) for r in r_inputs]
    in_specs += [pl.BlockSpec(memory_space=pltpu.MemorySpace.SMEM)]

    scratch = [pltpu.VMEM((H, layer_t[l]), jnp.float32) for l in range(1, L)]

    out = pl.pallas_call(
        kernel,
        out_shape=jax.ShapeDtypeStruct((B, H, T * S), jnp.float32),
        grid_spec=pltpu.PrefetchScalarGridSpec(
            num_scalar_prefetch=0,
            grid=(B, n_t),
            in_specs=in_specs,
            out_specs=pl.BlockSpec((1, H, tt * S), lambda b, ti: (b, 0, ti)),
            scratch_shapes=scratch,
        ),
        compiler_params=pltpu.CompilerParams(
            dimension_semantics=("parallel", "parallel"),
            vmem_limit_bytes=48 * 1024 * 1024,
        ),
    )(x, pad_mat, *wt_inputs, *r_inputs, bias_all)
    return out[:, None, :, :]


# -----------------------------------------------------------------------------
# Pure-JAX reference (direct ConvTranspose2d semantics) for validation
# -----------------------------------------------------------------------------
def reference_forward(c, params, upsample_scales):
    x = c[:, 0].astype(jnp.float32)
    for (w, b), s in zip(params, upsample_scales):
        kfz = w.shape[0]
        pad = (kfz - 1) // 2
        B, H, T = x.shape
        xp = jnp.pad(x, ((0, 0), (pad, pad), (0, 0)))
        acc = jnp.zeros((B, H, T, s), jnp.float32)
        for kf in range(kfz):
            r0 = 2 * pad - kf  # out[i] += x[i + pad - kf] * w[kf]  (x rows via xp)
            acc = acc + xp[:, r0:r0 + H, :, None] * w[kf][None, None, None, :]
        y = acc.reshape(B, H, T * s) + b
        x = jnp.where(y >= 0.0, y, NEG_SLOPE * y)
    return x[:, None, :, :]


if __name__ == "__main__":
    # hparams (defined in-script): upsample_scales, freq_axis_kernel_size
    upsample_scales = (4, 4)          # total upsampling factor 16
    freq_axis_kernel_size = 3

    B, F, T = 2, 16, 8                # small NCHW mel conditioning: (B, 1, F, T)
    key = jax.random.PRNGKey(0)
    key, ck = jax.random.split(key)
    c = jax.random.normal(ck, (B, 1, F, T), jnp.float32)

    params = init_params(key, upsample_scales, freq_axis_kernel_size)

    out = upsample_conv_forward(c, params, upsample_scales)
    out = jax.block_until_ready(out)

    assert out.shape == (B, 1, F, T * _prod(upsample_scales)), out.shape

    ref = reference_forward(c, params, upsample_scales)
    if not jnp.allclose(out, ref, rtol=1e-4, atol=1e-4):
        raise AssertionError("Pallas kernel output mismatch vs reference")

    print("KERNEL_OK")
</pallas_src>

<mosaic_0001>
module attributes {stable_mosaic.version = 11 : i64} {
  func.func @kernel(%arg0: i32, %arg1: i32, %arg2: memref<1x16x8xf32, #tpu.memory_space<vmem>>, %arg3: memref<18x16xf32, #tpu.memory_space<vmem>>, %arg4: memref<3x32xf32, #tpu.memory_space<vmem>>, %arg5: memref<3x128xf32, #tpu.memory_space<vmem>>, %arg6: memref<8x32xf32, #tpu.memory_space<vmem>>, %arg7: memref<32x128xf32, #tpu.memory_space<vmem>>, %arg8: memref<2xf32, #tpu.memory_space<smem>>, %arg9: memref<1x16x128xf32, #tpu.memory_space<vmem>>, %arg10: memref<16x32xf32, #tpu.memory_space<vmem>>) attributes {dimension_semantics = [#tpu.dimension_semantics<parallel>, #tpu.dimension_semantics<parallel>], iteration_bounds = array<i64: 2, 1>, scalar_prefetch = 0 : i64, scratch_operands = 1 : i64, tpu.core_type = #tpu.core_type<tc>, window_params = [{transform_indices = @transform_0, window_bounds = array<i64: 1, 16, 8>}, {pipeline_mode = #tpu.pipeline_mode<synchronous>, transform_indices = @transform_1, window_bounds = array<i64: 18, 16>}, {pipeline_mode = #tpu.pipeline_mode<synchronous>, transform_indices = @transform_2, window_bounds = array<i64: 3, 32>}, {pipeline_mode = #tpu.pipeline_mode<synchronous>, transform_indices = @transform_3, window_bounds = array<i64: 3, 128>}, {pipeline_mode = #tpu.pipeline_mode<synchronous>, transform_indices = @transform_4, window_bounds = array<i64: 8, 32>}, {pipeline_mode = #tpu.pipeline_mode<synchronous>, transform_indices = @transform_5, window_bounds = array<i64: 32, 128>}, {transform_indices = @transform_6, window_bounds = array<i64: 2>}, {transform_indices = @transform_7, window_bounds = array<i64: 1, 16, 128>}]} {
    %c0 = arith.constant 0 : index
    %c0_0 = arith.constant 0 : index
    %0 = vector.load %arg3[%c0, %c0_0] : memref<18x16xf32, #tpu.memory_space<vmem>>, vector<18x16xf32>
    %c0_1 = arith.constant 0 : index
    %1 = memref.load %arg8[%c0_1] : memref<2xf32, #tpu.memory_space<smem>>
    %c0_2 = arith.constant 0 : index
    %c0_3 = arith.constant 0 : index
    %2 = vector.load %arg6[%c0_2, %c0_3] : memref<8x32xf32, #tpu.memory_space<vmem>>, vector<8x32xf32>
    %c0_4 = arith.constant 0 : index
    %c0_5 = arith.constant 0 : index
    %3 = vector.load %arg4[%c0_4, %c0_5] : memref<3x32xf32, #tpu.memory_space<vmem>>, vector<1x32xf32>
    %4 = vector.shape_cast %3 : vector<1x32xf32> to vector<32xf32>
    %c1 = arith.constant 1 : index
    %c0_6 = arith.constant 0 : index
    %5 = vector.load %arg4[%c1, %c0_6] : memref<3x32xf32, #tpu.memory_space<vmem>>, vector<1x32xf32>
    %6 = vector.shape_cast %5 : vector<1x32xf32> to vector<32xf32>
    %c2 = arith.constant 2 : index
    %c0_7 = arith.constant 0 : index
    %7 = vector.load %arg4[%c2, %c0_7] : memref<3x32xf32, #tpu.memory_space<vmem>>, vector<1x32xf32>
    %8 = vector.shape_cast %7 : vector<1x32xf32> to vector<32xf32>
    %c0_8 = arith.constant 0 : index
    %c0_9 = arith.constant 0 : index
    %c0_10 = arith.constant 0 : index
    %9 = vector.load %arg2[%c0_8, %c0_9, %c0_10] : memref<1x16x8xf32, #tpu.memory_space<vmem>>, vector<1x16x8xf32>
    %10 = vector.shape_cast %9 : vector<1x16x8xf32> to vector<16x8xf32>
    %cst = arith.constant dense<0.000000e+00> : vector<18x8xf32>
    %11 = tpu.matmul %0, %10, %cst {dimension_numbers = #tpu.dot_dimension_numbers<[1], [0], [0], [1], [0, 0, 1, 1], [], []>} : vector<18x16xf32>, vector<16x8xf32>, vector<18x8xf32> -> vector<18x8xf32>
    %cst_11 = arith.constant dense<0.000000e+00> : vector<18x32xf32>
    %12 = tpu.matmul %11, %2, %cst_11 {dimension_numbers = #tpu.dot_dimension_numbers<[1], [0], [0], [1], [0, 0, 1, 1], [], []>} : vector<18x8xf32>, vector<8x32xf32>, vector<18x32xf32> -> vector<18x32xf32>
    %cst_12 = arith.constant 0.000000e+00 : f32
    %13 = vector.broadcast %cst_12 : f32 to vector<16x32xf32>
    %14 = vector.extract_strided_slice %12 {offsets = [2, 0], sizes = [16, 32], strides = [1, 1]} : vector<18x32xf32> to vector<16x32xf32>
    %15 = vector.shape_cast %4 : vector<32xf32> to vector<1x32xf32>
    %16 = vector.broadcast %15 : vector<1x32xf32> to vector<16x32xf32>
    %17 = arith.mulf %14, %16 : vector<16x32xf32>
    %18 = arith.addf %13, %17 : vector<16x32xf32>
    %19 = vector.extract_strided_slice %12 {offsets = [1, 0], sizes = [16, 32], strides = [1, 1]} : vector<18x32xf32> to vector<16x32xf32>
    %20 = vector.shape_cast %6 : vector<32xf32> to vector<1x32xf32>
    %21 = vector.broadcast %20 : vector<1x32xf32> to vector<16x32xf32>
    %22 = arith.mulf %19, %21 : vector<16x32xf32>
    %23 = arith.addf %18, %22 : vector<16x32xf32>
    %24 = vector.extract_strided_slice %12 {offsets = [0, 0], sizes = [16, 32], strides = [1, 1]} : vector<18x32xf32> to vector<16x32xf32>
    %25 = vector.shape_cast %8 : vector<32xf32> to vector<1x32xf32>
    %26 = vector.broadcast %25 : vector<1x32xf32> to vector<16x32xf32>
    %27 = arith.mulf %24, %26 : vector<16x32xf32>
    %28 = arith.addf %23, %27 : vector<16x32xf32>
    %29 = vector.broadcast %1 : f32 to vector<16x32xf32>
    %30 = arith.addf %28, %29 : vector<16x32xf32>
    %cst_13 = arith.constant 0.000000e+00 : f32
    %31 = vector.broadcast %cst_13 : f32 to vector<16x32xf32>
    %32 = arith.cmpf oge, %30, %31 : vector<16x32xf32>
    %cst_14 = arith.constant 2.000000e-01 : f32
    %33 = vector.broadcast %cst_14 : f32 to vector<16x32xf32>
    %34 = arith.mulf %33, %30 : vector<16x32xf32>
    %35 = arith.select %32, %30, %34 : vector<16x32xi1>, vector<16x32xf32>
    %c0_15 = arith.constant 0 : index
    %c0_16 = arith.constant 0 : index
    %36 = vector.load %arg10[%c0_15, %c0_16] : memref<16x32xf32, #tpu.memory_space<vmem>>, vector<16x32xf32>
    tpu.vector_store %arg10[%c0_15, %c0_16], %35 {strides = array<i32>} : memref<16x32xf32, #tpu.memory_space<vmem>>, vector<16x32xf32>,
    %c1_17 = arith.constant 1 : index
    %37 = memref.load %arg8[%c1_17] : memref<2xf32, #tpu.memory_space<smem>>
    %c0_18 = arith.constant 0 : index
    %c0_19 = arith.constant 0 : index
    %38 = vector.load %arg7[%c0_18, %c0_19] : memref<32x128xf32, #tpu.memory_space<vmem>>, vector<32x128xf32>
    %c0_20 = arith.constant 0 : index
    %c0_21 = arith.constant 0 : index
    %39 = vector.load %arg5[%c0_20, %c0_21] : memref<3x128xf32, #tpu.memory_space<vmem>>, vector<1x128xf32>
    %40 = vector.shape_cast %39 : vector<1x128xf32> to vector<128xf32>
    %c1_22 = arith.constant 1 : index
    %c0_23 = arith.constant 0 : index
    %41 = vector.load %arg5[%c1_22, %c0_23] : memref<3x128xf32, #tpu.memory_space<vmem>>, vector<1x128xf32>
    %42 = vector.shape_cast %41 : vector<1x128xf32> to vector<128xf32>
    %c2_24 = arith.constant 2 : index
    %c0_25 = arith.constant 0 : index
    %43 = vector.load %arg5[%c2_24, %c0_25] : memref<3x128xf32, #tpu.memory_space<vmem>>, vector<1x128xf32>
    %44 = vector.shape_cast %43 : vector<1x128xf32> to vector<128xf32>
    %c0_26 = arith.constant 0 : index
    %c0_27 = arith.constant 0 : index
    %45 = vector.load %arg10[%c0_26, %c0_27] : memref<16x32xf32, #tpu.memory_space<vmem>>, vector<16x32xf32>
    %cst_28 = arith.constant dense<0.000000e+00> : vector<18x32xf32>
    %46 = tpu.matmul %0, %45, %cst_28 {dimension_numbers = #tpu.dot_dimension_numbers<[1], [0], [0], [1], [0, 0, 1, 1], [], []>} : vector<18x16xf32>, vector<16x32xf32>, vector<18x32xf32> -> vector<18x32xf32>
    %cst_29 = arith.constant dense<0.000000e+00> : vector<18x128xf32>
    %47 = tpu.matmul %46, %38, %cst_29 {dimension_numbers = #tpu.dot_dimension_numbers<[1], [0], [0], [1], [0, 0, 1, 1], [], []>} : vector<18x32xf32>, vector<32x128xf32>, vector<18x128xf32> -> vector<18x128xf32>
    %cst_30 = arith.constant 0.000000e+00 : f32
    %48 = vector.broadcast %cst_30 : f32 to vector<16x128xf32>
    %49 = vector.extract_strided_slice %47 {offsets = [2, 0], sizes = [16, 128], strides = [1, 1]} : vector<18x128xf32> to vector<16x128xf32>
    %50 = vector.shape_cast %40 : vector<128xf32> to vector<1x128xf32>
    %51 = vector.broadcast %50 : vector<1x128xf32> to vector<16x128xf32>
    %52 = arith.mulf %49, %51 : vector<16x128xf32>
    %53 = arith.addf %48, %52 : vector<16x128xf32>
    %54 = vector.extract_strided_slice %47 {offsets = [1, 0], sizes = [16, 128], strides = [1, 1]} : vector<18x128xf32> to vector<16x128xf32>
    %55 = vector.shape_cast %42 : vector<128xf32> to vector<1x128xf32>
    %56 = vector.broadcast %55 : vector<1x128xf32> to vector<16x128xf32>
    %57 = arith.mulf %54, %56 : vector<16x128xf32>
    %58 = arith.addf %53, %57 : vector<16x128xf32>
    %59 = vector.extract_strided_slice %47 {offsets = [0, 0], sizes = [16, 128], strides = [1, 1]} : vector<18x128xf32> to vector<16x128xf32>
    %60 = vector.shape_cast %44 : vector<128xf32> to vector<1x128xf32>
    %61 = vector.broadcast %60 : vector<1x128xf32> to vector<16x128xf32>
    %62 = arith.mulf %59, %61 : vector<16x128xf32>
    %63 = arith.addf %58, %62 : vector<16x128xf32>
    %64 = vector.broadcast %37 : f32 to vector<16x128xf32>
    %65 = arith.addf %63, %64 : vector<16x128xf32>
    %cst_31 = arith.constant 0.000000e+00 : f32
    %66 = vector.broadcast %cst_31 : f32 to vector<16x128xf32>
    %67 = arith.cmpf oge, %65, %66 : vector<16x128xf32>
    %cst_32 = arith.constant 2.000000e-01 : f32
    %68 = vector.broadcast %cst_32 : f32 to vector<16x128xf32>
    %69 = arith.mulf %68, %65 : vector<16x128xf32>
    %70 = arith.select %67, %65, %69 : vector<16x128xi1>, vector<16x128xf32>
    %c0_33 = arith.constant 0 : index
    %c0_34 = arith.constant 0 : index
    %c0_35 = arith.constant 0 : index
    %71 = vector.load %arg9[%c0_33, %c0_34, %c0_35] : memref<1x16x128xf32, #tpu.memory_space<vmem>>, vector<1x16x128xf32>
    %72 = vector.shape_cast %71 : vector<1x16x128xf32> to vector<16x128xf32>
    %73 = vector.shape_cast %70 : vector<16x128xf32> to vector<1x16x128xf32>
    tpu.vector_store %arg9[%c0_33, %c0_34, %c0_35], %73 {strides = array<i32>} : memref<1x16x128xf32, #tpu.memory_space<vmem>>, vector<1x16x128xf32>,
    return
  }
  func.func @transform_0(%arg0: i32, %arg1: i32) -> (i32, i32, i32) {
    %c0_i32 = arith.constant 0 : i32
    %c0_i32_0 = arith.constant 0 : i32
    return %arg0, %c0_i32, %arg1 : i32, i32, i32
  }
  func.func @transform_1(%arg0: i32, %arg1: i32) -> (i32, i32) {
    %c0_i32 = arith.constant 0 : i32
    %c0_i32_0 = arith.constant 0 : i32
    %c0_i32_1 = arith.constant 0 : i32
    return %c0_i32, %c0_i32_0 : i32, i32
  }
  func.func @transform_2(%arg0: i32, %arg1: i32) -> (i32, i32) {
    %c0_i32 = arith.constant 0 : i32
    %c0_i32_0 = arith.constant 0 : i32
    %c0_i32_1 = arith.constant 0 : i32
    return %c0_i32, %c0_i32_0 : i32, i32
  }
  func.func @transform_3(%arg0: i32, %arg1: i32) -> (i32, i32) {
    %c0_i32 = arith.constant 0 : i32
    %c0_i32_0 = arith.constant 0 : i32
    %c0_i32_1 = arith.constant 0 : i32
    return %c0_i32, %c0_i32_0 : i32, i32
  }
  func.func @transform_4(%arg0: i32, %arg1: i32) -> (i32, i32) {
    %c0_i32 = arith.constant 0 : i32
    %c0_i32_0 = arith.constant 0 : i32
    %c0_i32_1 = arith.constant 0 : i32
    return %c0_i32, %c0_i32_0 : i32, i32
  }
  func.func @transform_5(%arg0: i32, %arg1: i32) -> (i32, i32) {
    %c0_i32 = arith.constant 0 : i32
    %c0_i32_0 = arith.constant 0 : i32
    %c0_i32_1 = arith.constant 0 : i32
    return %c0_i32, %c0_i32_0 : i32, i32
  }
  func.func @transform_6(%arg0: i32, %arg1: i32) -> i32 {
    %c0_i32 = arith.constant 0 : i32
    %c0_i32_0 = arith.constant 0 : i32
    return %c0_i32 : i32
  }
  func.func @transform_7(%arg0: i32, %arg1: i32) -> (i32, i32, i32) {
    %c0_i32 = arith.constant 0 : i32
    %c0_i32_0 = arith.constant 0 : i32
    return %arg0, %c0_i32, %arg1 : i32, i32, i32
  }
}

</mosaic_0001>

<bundles_post_ra>
// kernel: tpu_custom_call.1
= control target key start
LH: loop header
LB: loop body
LE: loop exit
PB: predicated region body
PF: predicated region fallthrough
CT: control target
= control target key end

     0   :  { %12 = vsyncpa [#allocation5], 0  ;;  %s1111_s0 = inlined_call_operand.vmem [shape: f32[2,16,8], index: 0, kind: input, shape index: {}]   ;;  %s1112_s1 = inlined_call_operand.vmem [shape: f32[18,16], index: 1, kind: input, shape index: {}]   ;;  %s1113_s2 = inlined_call_operand.vmem [shape: f32[3,32], index: 2, kind: input, shape index: {}]   ;;  %s1114_s3 = inlined_call_operand.vmem [shape: f32[3,128], index: 3, kind: input, shape index: {}]   ;;  %s1115_s4 = inlined_call_operand.vmem [shape: f32[8,32], index: 4, kind: input, shape index: {}]   ;;  %s1116_s5 = inlined_call_operand.vmem [shape: f32[32,128], index: 5, kind: input, shape index: {}]   ;;  %s1117_s6 = inlined_call_operand.vmem [shape: f32[2], index: 6, kind: input, shape index: {}]   ;;  %s1118_s7 = inlined_call_operand.hbm [shape: f32[2,16,128], index: 7, kind: output, shape index: {}]  }
   0x1   :  { %13 = vsyncpa [#allocation4], 0 }
   0x2   :  { %15 = vsyncpa [#allocation4 + $0x1], 0  ;;  %s937_s24 = smov 0   ;;  %s939_s25 = smov 0  }
   0x3   :  { %s941_s26 = smov 0   ;;  %s943_s27 = smov 0  }
   0x4   :  { %s945_s28 = smov 0   ;;  %s947_s29 = smov 0  }
   0x5 LB: > { %s691_s30 = sadd.s32 4294967295, %s892_s29   ;;  %s692_s8 = sadd.s32 4294967294, %s892_s29   ;;  %s892_s29 = sphi %s947_s29, %s21_s29   ;;  %s888_s28 = sphi %s945_s28, %s1125_s28   ;;  %s884_s27 = sphi %s943_s27, %s1124_s27   ;;  %s880_s26 = sphi %s941_s26, %s1123_s26   ;;  %s876_s25 = sphi %s939_s25, %s1122_s25   ;;  %s872_s24 = sphi %s937_s24, %s1121_s24  }
   0x6   : > { %s33_s9 = sadd.s32 1, %s888_s28  ;;  %s196_s10 = sadd.s32 1, %s880_s26 }
   0x7   : > { %p35_p0 = scmp.ge.s32.totalorder %s33_s9, 2  ;;  %p206_p1 = scmp.ne.s32.totalorder %s880_s26, %s876_s25 }
   0x8   : > { %p207_p2 = scmp.eq.s32.totalorder %s691_s30, 1  ;;  %p212_p3 = scmp.ne.s32.totalorder %s876_s25, %s872_s24 }
   0x9   : > { %s1127_s9 = smov (%p35_p0, %s33_s9), 0  ;;  %p213_p5 = scmp.eq.s32.totalorder %s692_s8, 1 }
   0xa   : > { %p977_p4 = por %p207_p2, %p206_p1  ;;  %s191_s12 = ssub.s32 %s888_s28, %s1127_s9 }
   0xb   : > { %p693_p6 = scmp.ge.s32.totalorder %s892_s29, 1  ;;  %p194_p7 = scmp.eq.s32.totalorder %s191_s12, 0 }
   0xc   : > { %p984_p8 = por %p213_p5, %p212_p3  ;;  %p220_p9 = scmp.lt.s32.totalorder %s892_s29, 3 }
   0xd   : > { %s990_s14 = scalar_select %p194_p7, %s880_s26, %s196_s10  }
   0xe   : > { %p221_p10 = pnand %p693_p6, %p220_p9  ;;  %p735_p11 = scmp.eq.s32.totalorder %s691_s30, 0 }
   0xf   : > { %s247_s17 = sshll.u32 %s1117_s6, 4  ;;  %s894_s18 = smov [#allocation3]   ;;  %s248_s17 = int_to_ptr.vmem [resolvable:$true] %s247_s17 }
  0x10   : > { %p727_p12 = pneg %p221_p10  ;;  %271 = sbr.rel (%p221_p10) target bundleno = 625 (0x271), region = 48 }
  0x12   : > { %p728_p13 = pnand %p735_p11, %p727_p12 }
  0x14   : > { %730 = dma.vmem_to_smem (!%p728_p13), %s248_s17, 16, %s894_s18, [#allocation5]  }
  0x15   : > { %863 = dma.done.wait (%p735_p11), [#allocation5], 16  }
  0x16   : > { %865 = vsyncadd (%p735_p11), [#allocation5], 4294967280 }
  0x17   : > { %278 = sfence }
  0x18   : > { %p308_p0 = scmp.lt.s32.totalorder %s884_s27, 1  ;;  %v1003_v2 = vld [vmem:[%s1112_s1] sm:$0xff]  ;;  %vm326_vm0 = vcmask 130048   ;;  %v1010_v3 = vld [vmem:[%s1112_s1 + $0x8] sm:$0xff]  ;;  %v1017_v4 = vld [vmem:[%s1112_s1 + $0x10] sm:$0x3] }
  0x19   : > { %v320_v5 = vld [vmem:[%s1115_s4] sm:$0xff]  ;;  %vm362_vm1 = vcmask 64512   ;;  %vm452_vm2 = vcmask 261122   ;;  %vm412_vm3 = vcmask 1040384   ;;  %vm429_vm5 = vcmask 1041408   ;;  %v462_v45 = vld [vmem:[%s1116_s5 + $0x18] sm:$0xff] }
  0x1a   : > { %s309_s19 = scalar_select %p308_p0, %s884_s27, 1  ;;  %387 = vmatpush.msra.mxu1 %v320_v5  ;;  %v790_v9 = vld [vmem:[%s1113_s2 + $0x1] ss:$0 sm:$0xff]  ;;  %v791_v10 = vld [vmem:[%s1113_s2 + $0x2] ss:$0 sm:$0xff]  ;;  %vm454_vm7 = vcmask 261120   ;;  %515 = vmatpush.msra.mxu3 %v462_v45 }
  0x1b   : > { %v789_v11 = vld [vmem:[%s1113_s2] ss:$0 sm:$0xff]  ;;  %v461_v46 = vld [vmem:[%s1116_s5 + $0x10] sm:$0xff]  ;;  %vm456_vm9 = vcmask 254976   ;;  %v460_v48 = vld [vmem:[%s1116_s5 + $0x8] sm:$0xff]  ;;  %s707_s8 = sld [smem:[#allocation3 + $0x1]] }
  0x1c   : > { %s719_s20 = sshll.u32 %s309_s19, 4  ;;  %516 = vmatpush.msra.mxu3 %v461_v46  ;;  %v459_v52 = vld [vmem:[%s1116_s5] sm:$0xff]  ;;  %s305_s15 = sand.u32 1, %s876_s25  }
  0x1d   : > { %s315_s23 = scalar_lea.vmem %s1111_s0, %s719_s20  ;;  %v793_v56 = vld [vmem:[%s1114_s3 + $0x1] ss:$0 sm:$0xff]  ;;  %v794_v57 = vld [vmem:[%s1114_s3 + $0x2] ss:$0 sm:$0xff]  ;;  %v792_v58 = vld [vmem:[%s1114_s3] ss:$0 sm:$0xff] }
  0x1e   : > { %v325_v0 = vld [vmem:[%s315_s23 + $0x8] sm:$0xff]  ;;  %v324_v1 = vld [vmem:[%s315_s23] sm:$0xff]  ;;  %s319_s23 = sld [smem:[#allocation3]]  ;;  %517 = vmatpush.msra.mxu3 %v460_v48  ;;  %s698_s16 = sshll.u32 %s305_s15, 4 }
  0x1f   : > { %350 = vmatpush.msra.mxu0 %v325_v0  ;;  %s307_s17 = scalar_lea.vmem [#allocation6], %s698_s16  ;;  %s720_s18 = sshll.u32 %s884_s27, 4 }
  0x20   : > { %518 = vmatpush.msra.mxu3 %v459_v52  ;;  %s597_s21 = scalar_lea.hbm %s1118_s7, %s720_s18  ;;  %s598_s22 = sshll.u32 %s307_s17, 4  ;;  %s599_s22 = int_to_ptr.vmem [resolvable:$true] %s598_s22 }
  0x21   : > { %351 = vmatpush.msra.mxu0 %v324_v1  ;;  %s585_s27 = scalar_lea.sflag [#allocation4], %s305_s15  ;;  %s830_s16 = scalar_lea.hbm %s1118_s7, 32 }
  0x22   : > { %701 = vmatmul.msk.f32.vlgmr.msra.gmra.mxu0 %vm326_vm0, %v1003_v2 }
  0x24   : > { %v439_v19 = vstv %s319_s23  ;;  %s600_s23 = sshll.u32 %s597_s21, 4  ;;  %s601_s23 = int_to_ptr.hbm [resolvable:$true] %s600_s23 }
  0x25   : > { %s824_s30 = sshra.s32 %s601_s23, 4  ;;  %s825_s30 = int_to_ptr.hbm [resolvable:$true] %s824_s30 }
  0x26   : > { %p831_p5 = scmp.lt.s32.totalorder %s825_s30, %s1118_s7 }
  0x2a   : > { %702 = vmatmul.msk.f32.gmra.mxu0 %vm326_vm0, %v1010_v3 }
  0x32   : > { %703 = vmatmul.msk.f32.gmra.mxu0 %vm326_vm0, %v1017_v4 }
  0x9f   : > { %v353_v6 = vpop.f32.mrf.mxu0 }
  0xa0   : > { %704 = vmatmul.msk.f32.vlgmr.msra.gmra.mxu1 %vm362_vm1, %v353_v6 }
  0xa7   : > { %v356_v7 = vpop.f32.mrf.mxu0 }
  0xa8   : > { %705 = vmatmul.msk.f32.gmra.mxu1 %vm362_vm1, %v356_v7 }
  0xaf   : > { %v359_v8 = vpop.f32.mrf.mxu0 }
  0xb0   : > { %706 = vmatmul.msk.f32.gmra.mxu1 %vm362_vm1, %v359_v8 }
 0x11d   : > { %v389_v12 = vpop.f32.mrf.mxu1 }
 0x11e   : > { %v406_v13 = vmul.f32 %v790_v9, %v389_v12  ;;  %v425_v14 = vmul.f32 %v791_v10, %v389_v12  ;;  %v399_v15 = vmul.f32 %v789_v11, %v389_v12 }
 0x120   : > { %v413_v16 = vrot.slane %v406_v13, 7  ;;  %v430_v18 = vrot.slane %v425_v14, 6 }
 0x122   : > { %v421_v17 = vadd.f32 %v413_v16, %v399_v15 }
 0x124   : > { %v436_v20 = vadd.f32 %v430_v18, %v421_v17 }
 0x125   : > { %v392_v21 = vpop.f32.mrf.mxu1 }
 0x126   : > { %v440_v22 = vadd.f32 %v439_v19, %v436_v20  ;;  %v407_v23 = vmul.f32 %v790_v9, %v392_v21  ;;  %v426_v24 = vmul.f32 %v791_v10, %v392_v21  ;;  %v400_v28 = vmul.f32 %v789_v11, %v392_v21 }
 0x128   : > { %vm443_vm4 = vcmp.ge.f32.partialorder %v440_v22, 0.0  ;;  %v446_v25 = vmul.f32 0.2, %v440_v22  ;;  %v414_v26 = vrot.slane %v407_v23, 7  ;;  %v431_v27 = vrot.slane %v426_v24, 6 }
 0x12a   : > { %v449_v29 = vsel %vm443_vm4, %v440_v22, %v446_v25  ;;  %v415_v30 = vsel %vm412_vm3, %v413_v16, %v414_v26  ;;  %v432_v32 = vsel %vm429_vm5, %v430_v18, %v431_v27 }
 0x12b   : > { %453 = vst.msk [vmem:[#allocation2 - $0x2] sm:$0xfc] %vm452_vm2, %v449_v29  ;;  %v422_v31 = vadd.f32 %v415_v30, %v400_v28 }
 0x12d   : > { %v437_v33 = vadd.f32 %v432_v32, %v422_v31  ;;  %v395_v34 = vpop.f32.mrf.mxu1 }
 0x12e   : > { %v408_v35 = vmul.f32 %v790_v9, %v395_v34  ;;  %v401_v39 = vmul.f32 %v789_v11, %v395_v34 }
 0x12f   : > { %v441_v36 = vadd.f32 %v439_v19, %v437_v33 }
 0x130   : > { %v416_v37 = vrot.slane %v408_v35, 7 }
 0x131   : > { %vm444_vm6 = vcmp.ge.f32.partialorder %v441_v36, 0.0  ;;  %v447_v38 = vmul.f32 0.2, %v441_v36 }
 0x132   : > { %v417_v40 = vsel %vm412_vm3, %v414_v26, %v416_v37 }
 0x133   : > { %v450_v41 = vsel %vm444_vm6, %v441_v36, %v447_v38  ;;  %v423_v42 = vadd.f32 %v417_v40, %v401_v39 }
 0x134   : > { %455 = vst.msk [vmem:[#allocation2 + $0x6] sm:$0xff] %vm454_vm7, %v450_v41 }
 0x135   : > { %v438_v43 = vadd.f32 %v431_v27, %v423_v42 }
 0x137   : > { %v442_v44 = vadd.f32 %v439_v19, %v438_v43 }
 0x139   : > { %vm445_vm8 = vcmp.ge.f32.partialorder %v442_v44, 0.0  ;;  %v448_v47 = vmul.f32 0.2, %v442_v44 }
 0x13b   : > { %v451_v49 = vsel %vm445_vm8, %v442_v44, %v448_v47  ;;  %v466_v51 = vld [vmem:[#allocation2] sm:$0xff] }
 0x13c   : > { %457 = vst.msk [vmem:[#allocation2 + $0xe] sm:$0x3] %vm456_vm9, %v451_v49 }
 0x143   : > { %v467_v50 = vld [vmem:[#allocation2 + $0x8] sm:$0xff] }
 0x144   : > { %482 = vmatpush.msra.mxu2 %v467_v50 }
 0x146   : > { %483 = vmatpush.msra.mxu2 %v466_v51 }
 0x147   : > { %708 = vmatmul.msk.f32.vlgmr.msra.gmra.mxu2 %vm326_vm0, %v1003_v2  ;;  %v568_v2 = vstv %s707_s8  ;;  %s826_s8 = scalar_lea.hbm %s825_s30, 16 }
 0x148   : > { %p827_p1 = scmp.ne.s32.totalorder %s825_s30, %s826_s8  ;;  %p832_p6 = scmp.lt.s32.totalorder %s830_s16, %s826_s8 }
 0x14a   : > { %p828_p2 = pnand %p827_p1, %p977_p4  ;;  %p833_p7 = por %p832_p6, %p831_p5 }
 0x14c   : > { %p829_p3 = pneg %p828_p2 }
 0x14e   : > { %p834_p9 = pnand %p833_p7, %p829_p3 }
 0x14f   : > { %709 = vmatmul.msk.f32.gmra.mxu2 %vm326_vm0, %v1010_v3 }
 0x157   : > { %710 = vmatmul.msk.f32.gmra.mxu2 %vm326_vm0, %v1017_v4 }
 0x1ca   : > { %v485_v53 = vpop.f32.mrf.mxu2 }
 0x1cb   : > { %711 = vmatmul.msk.f32.vlgmr.msra.gmra.mxu3 %vm454_vm7, %v485_v53 }
 0x1d2   : > { %v488_v54 = vpop.f32.mrf.mxu2 }
 0x1d3   : > { %712 = vmatmul.msk.f32.gmra.mxu3 %vm454_vm7, %v488_v54 }
 0x1da   : > { %v491_v55 = vpop.f32.mrf.mxu2 }
 0x1db   : > { %713 = vmatmul.msk.f32.gmra.mxu3 %vm454_vm7, %v491_v55 }
 0x24e   : > { %v520_v59 = vpop.f32.mrf.mxu3 }
 0x24f   : > { %v537_v60 = vmul.f32 %v793_v56, %v520_v59  ;;  %v555_v61 = vmul.f32 %v794_v57, %v520_v59  ;;  %v530_v62 = vmul.f32 %v792_v58, %v520_v59 }
 0x251   : > { %v543_v63 = vrot.slane %v537_v60, 7  ;;  %v559_v1 = vrot.slane %v555_v61, 6 }
 0x253   : > { %v551_v0 = vadd.f32 %v543_v63, %v530_v62 }
 0x255   : > { %v565_v3 = vadd.f32 %v559_v1, %v551_v0 }
 0x256   : > { %v523_v4 = vpop.f32.mrf.mxu3 }
 0x257   : > { %v569_v5 = vadd.f32 %v568_v2, %v565_v3  ;;  %v538_v6 = vmul.f32 %v793_v56, %v523_v4  ;;  %v556_v7 = vmul.f32 %v794_v57, %v523_v4  ;;  %v531_v11 = vmul.f32 %v792_v58, %v523_v4 }
 0x259   : > { %vm572_vm10 = vcmp.ge.f32.partialorder %v569_v5, 0.0  ;;  %v575_v8 = vmul.f32 0.2, %v569_v5  ;;  %v544_v9 = vrot.slane %v538_v6, 7  ;;  %v560_v10 = vrot.slane %v556_v7, 6 }
 0x25b   : > { %v578_v12 = vsel %vm572_vm10, %v569_v5, %v575_v8  ;;  %v545_v13 = vsel %vm412_vm3, %v543_v63, %v544_v9  ;;  %v561_v15 = vsel %vm429_vm5, %v559_v1, %v560_v10 }
 0x25c   : > { %581 = vst [vmem:[%s307_s17 - $0x2] sm:$0xfc] %v578_v12  ;;  %v552_v14 = vadd.f32 %v545_v13, %v531_v11 }
 0x25e   : > { %v566_v16 = vadd.f32 %v561_v15, %v552_v14  ;;  %v526_v17 = vpop.f32.mrf.mxu3 }
 0x25f   : > { %v539_v18 = vmul.f32 %v793_v56, %v526_v17  ;;  %v532_v22 = vmul.f32 %v792_v58, %v526_v17 }
 0x260   : > { %v570_v19 = vadd.f32 %v568_v2, %v566_v16 }
 0x261   : > { %v546_v20 = vrot.slane %v539_v18, 7 }
 0x262   : > { %vm573_vm11 = vcmp.ge.f32.partialorder %v570_v19, 0.0  ;;  %v576_v21 = vmul.f32 0.2, %v570_v19 }
 0x263   : > { %v547_v23 = vsel %vm412_vm3, %v544_v9, %v546_v20 }
 0x264   : > { %v579_v24 = vsel %vm573_vm11, %v570_v19, %v576_v21  ;;  %v553_v25 = vadd.f32 %v547_v23, %v532_v22 }
 0x265   : > { %582 = vst [vmem:[%s307_s17 + $0x6] sm:$0xff] %v579_v24 }
 0x266   : > { %v567_v26 = vadd.f32 %v560_v10, %v553_v25 }
 0x268   : > { %v571_v27 = vadd.f32 %v568_v2, %v567_v26 }
 0x26a   : > { %vm574_vm12 = vcmp.ge.f32.partialorder %v571_v27, 0.0  ;;  %v577_v28 = vmul.f32 0.2, %v571_v27 }
 0x26c   : > { %v580_v29 = vsel %vm574_vm12, %v571_v27, %v577_v28 }
 0x26d   : > { %583 = vst [vmem:[%s307_s17 + $0xe] sm:$0x3] %v580_v29 }
 0x26e   : > { %837 = shalt.err (!%p834_p9)
}
 0x26f   : > { %s895_s15 = smov 128   ;;  %s896_s17 = smov 8  }
 0x270   : > { %725 = dma.vmem_to_hbm [thread:$0]  (%p977_p4), %s599_s22, 256, %s601_s23, %s585_s27, %s895_s15, %s895_s15, %s896_s17  }
 0x271 PF: > { %p737_p10 = scmp.ge.s32.totalorder %s892_s29, 2  ;;  %s615_s20 = sand.u32 1, %s872_s24  }
 0x272   : > { %s616_s21 = scalar_lea.sflag [#allocation4], %s615_s20 }
 0x273   : > { %p732_p11 = pnand %p737_p10, %p984_p8 }
 0x275   : > { %p733_p12 = pneg %p732_p11 }
 0x277   : > { %867 = dma.done.wait (%p733_p12), %s616_s21, 256  }
 0x278   : > { %869 = vsyncadd (%p733_p12), %s616_s21, 4294967040  ;;  %s21_s29 = sadd.s32 1, %s892_s29   ;;  %s1121_s24 = smov %s876_s25 }
 0x279   : > { %p18_p13 = scmp.ge.s32.totalorder %s21_s29, 4   ;;  %s1122_s25 = smov %s880_s26 }
 0x27a   : > { %s1123_s26 = smov %s990_s14  ;;  %s1124_s27 = smov %s888_s28 }
 0x27b   : > { %s1125_s28 = smov %s1127_s9  ;;  %20 = sbr.rel (!%p18_p13) target bundleno = 5 (0x5), region = 88 }
 0x280   :  { %622 = vsyncpa [#allocation4], 1 }
 0x281   :  { %624 = vsyncpa [#allocation4 + $0x1], 1 }
 0x282   :  { %625 = vsyncpa [#allocation5], 1 }
 0x283   :  { %627 = vsyncpa [#allocation5 + $0x1], 1 }

</bundles_post_ra>
